<compile_context>
chip_gen: v7x
topology: tpu7x:2x2x1
jax: 0.10.0
libtpu: 0.0.40
codegen_flags: <defaults>
</compile_context>

<pallas_src>
import functools

import jax
import jax.numpy as jnp
from jax import lax
from jax.experimental import pallas as pl
from jax.experimental.pallas import tpu as pltpu


def _contrastive_kernel(out_ref, cor_ref, fh_ref, ph_ref, fe_ref, pe_ref,
                        res_ref, *, factor):
    o = out_ref[...].astype(jnp.float32)
    oo = jnp.sum(o * o, axis=1, keepdims=True)           # ||output||^2, (TB, 1)

    def cos_sim(x_ref):
        x = x_ref[...].astype(jnp.float32)
        xx = jnp.sum(x * x, axis=1, keepdims=True)
        dot = jnp.sum(o * x, axis=1, keepdims=True)
        # dot / ||x|| / ||o||  ==  dot * rsqrt(||x||^2 * ||o||^2)
        # (no epsilon, matching the PyTorch reference exactly)
        return dot * lax.rsqrt(xx * oo)

    pos = cos_sim(cor_ref)     # positive_pro
    n1 = cos_sim(fh_ref)       # negative_pro1 (future_hard)
    n2 = cos_sim(ph_ref)       # negative_pro2 (previous_hard)
    n3 = cos_sim(fe_ref)       # negative_pro3 (future_easy)
    n4 = cos_sim(pe_ref)       # negative_pro4 (previous_easy)

    denom = jnp.exp(pos) + factor * (jnp.exp(n1) + jnp.exp(n2)
                                     + jnp.exp(n3) + jnp.exp(n4))
    # -log(exp(pos) / denom) == log(denom) - pos
    loss = jnp.log(denom) - pos
    c1 = ((pos > n1) & (pos > n2)).astype(jnp.float32)   # accuracy1 indicator
    c2 = ((pos > n3) & (pos > n4)).astype(jnp.float32)   # accuracy2 indicator

    # single packed (TB, 3) output tile: [loss, correct1, correct2]
    res_ref[:, 0:1] = loss
    res_ref[:, 1:2] = c1
    res_ref[:, 2:3] = c2


def _round_up(x, m):
    return -(-x // m) * m


def _pick_block_rows(B, D, in_itemsize, budget_bytes=14 << 20):
    """Batch-tile rows: biggest tile that honestly fits the VMEM budget while
    keeping a multi-step grid whenever B is large enough."""
    d_pad = _round_up(D, 128)                             # lane padding
    # sublane multiple for the input dtype's native tiling
    sub = 8 if in_itemsize >= 4 else (16 if in_itemsize == 2 else 32)
    bytes_per_row = (6 * 2 * d_pad * in_itemsize          # 6 inputs, double-buffered
                     + 4 * d_pad * 4                      # ~4 live f32 temps (o, x, x*x, o*x)
                     + 2 * 3 * 4)                         # packed (TB,3) f32 out, double-buffered
    tb_fit = max(sub, (budget_bytes // bytes_per_row) // sub * sub)
    # keep >= ~2-8 grid steps when B is large (pipelining + v7x 2-TC sharding)
    tb_steps = max(256, _round_up(pl.cdiv(B, 8), sub))
    tb = min(1024, tb_fit, tb_steps)
    tb = max(sub, (tb // sub) * sub)
    if tb >= B:
        return B                                          # B too small to split
    return tb


def contrastive_loss(output, correct, future_hard, previous_hard,
                     future_easy, previous_easy, factor=1.0):
    B, D = output.shape
    itemsize = jnp.dtype(output.dtype).itemsize
    TB = _pick_block_rows(B, D, itemsize)
    grid = (pl.cdiv(B, TB),)

    in_spec = pl.BlockSpec((TB, D), lambda i: (i, 0))
    out_spec = pl.BlockSpec((TB, 3), lambda i: (i, 0))

    kernel = functools.partial(_contrastive_kernel, factor=float(factor))

    packed = pl.pallas_call(
        kernel,
        grid=grid,
        in_specs=[in_spec] * 6,
        out_specs=out_spec,
        out_shape=jax.ShapeDtypeStruct((B, 3), jnp.float32),
        compiler_params=pltpu.CompilerParams(
            dimension_semantics=("parallel",),
            vmem_limit_bytes=40 << 20),
    )(output, correct, future_hard, previous_hard, future_easy, previous_easy)

    loss = packed[:, 0]                # (B,) per-sample loss (matches torch)
    accuracy1 = jnp.mean(packed[:, 1])  # correct1_num / B
    accuracy2 = jnp.mean(packed[:, 2])  # correct2_num / B
    return loss, accuracy1, accuracy2


if __name__ == "__main__":
    B, D = 8, 32
    key = jax.random.PRNGKey(0)
    keys = jax.random.split(key, 6)
    output = jax.random.normal(keys[0], (B, D), dtype=jnp.float32)
    correct = jax.random.normal(keys[1], (B, D), dtype=jnp.float32)
    future_hard = jax.random.normal(keys[2], (B, D), dtype=jnp.float32)
    previous_hard = jax.random.normal(keys[3], (B, D), dtype=jnp.float32)
    future_easy = jax.random.normal(keys[4], (B, D), dtype=jnp.float32)
    previous_easy = jax.random.normal(keys[5], (B, D), dtype=jnp.float32)

    loss, acc1, acc2 = contrastive_loss(
        output, correct, future_hard, previous_hard, future_easy,
        previous_easy, factor=1.0)
    jax.block_until_ready((loss, acc1, acc2))

    # reference check in plain JAX (mirrors the PyTorch forward)
    def ref(o, c, f1, p1, f2, p2, factor=1.0):
        on = jnp.linalg.norm(o, axis=1)

        def cs(x):
            return jnp.sum(o * x, axis=1) / jnp.linalg.norm(x, axis=1) / on

        pp, n1, n2, n3, n4 = cs(c), cs(f1), cs(p1), cs(f2), cs(p2)
        l = -jnp.log(jnp.exp(pp) / (jnp.exp(pp) + factor * (
            jnp.exp(n1) + jnp.exp(n2) + jnp.exp(n3) + jnp.exp(n4))))
        a1 = jnp.mean(((pp > n1) & (pp > n2)).astype(jnp.float32))
        a2 = jnp.mean(((pp > n3) & (pp > n4)).astype(jnp.float32))
        return l, a1, a2

    rl, ra1, ra2 = ref(output, correct, future_hard, previous_hard,
                       future_easy, previous_easy)
    assert jnp.allclose(loss, rl, atol=1e-5, rtol=1e-5), (loss, rl)
    assert jnp.allclose(acc1, ra1) and jnp.allclose(acc2, ra2)
    print("KERNEL_OK")
</pallas_src>

<mosaic_0001>
module attributes {stable_mosaic.version = 11 : i64} {
  func.func @_contrastive_kernel(%arg0: i32, %arg1: memref<8x32xf32, #tpu.memory_space<vmem>>, %arg2: memref<8x32xf32, #tpu.memory_space<vmem>>, %arg3: memref<8x32xf32, #tpu.memory_space<vmem>>, %arg4: memref<8x32xf32, #tpu.memory_space<vmem>>, %arg5: memref<8x32xf32, #tpu.memory_space<vmem>>, %arg6: memref<8x32xf32, #tpu.memory_space<vmem>>, %arg7: memref<8x3xf32, #tpu.memory_space<vmem>>) attributes {dimension_semantics = [#tpu.dimension_semantics<parallel>], iteration_bounds = array<i64: 1>, scalar_prefetch = 0 : i64, scratch_operands = 0 : i64, tpu.core_type = #tpu.core_type<tc>, window_params = [{transform_indices = @transform_0, window_bounds = array<i64: 8, 32>}, {transform_indices = @transform_1, window_bounds = array<i64: 8, 32>}, {transform_indices = @transform_2, window_bounds = array<i64: 8, 32>}, {transform_indices = @transform_3, window_bounds = array<i64: 8, 32>}, {transform_indices = @transform_4, window_bounds = array<i64: 8, 32>}, {transform_indices = @transform_5, window_bounds = array<i64: 8, 32>}, {transform_indices = @transform_6, window_bounds = array<i64: 8, 3>}]} {
    %c0 = arith.constant 0 : index
    %c0_0 = arith.constant 0 : index
    %0 = vector.load %arg1[%c0, %c0_0] : memref<8x32xf32, #tpu.memory_space<vmem>>, vector<8x32xf32>
    %1 = arith.mulf %0, %0 : vector<8x32xf32>
    %cst = arith.constant dense<0.000000e+00> : vector<8xf32>
    %2 = vector.multi_reduction <add>, %1, %cst [1] : vector<8x32xf32> to vector<8xf32>
    %3 = vector.shape_cast %2 : vector<8xf32> to vector<8x1xf32>
    %c0_1 = arith.constant 0 : index
    %c0_2 = arith.constant 0 : index
    %4 = vector.load %arg2[%c0_1, %c0_2] : memref<8x32xf32, #tpu.memory_space<vmem>>, vector<8x32xf32>
    %5 = arith.mulf %4, %4 : vector<8x32xf32>
    %cst_3 = arith.constant dense<0.000000e+00> : vector<8xf32>
    %6 = vector.multi_reduction <add>, %5, %cst_3 [1] : vector<8x32xf32> to vector<8xf32>
    %7 = vector.shape_cast %6 : vector<8xf32> to vector<8x1xf32>
    %8 = arith.mulf %0, %4 : vector<8x32xf32>
    %cst_4 = arith.constant dense<0.000000e+00> : vector<8xf32>
    %9 = vector.multi_reduction <add>, %8, %cst_4 [1] : vector<8x32xf32> to vector<8xf32>
    %10 = vector.shape_cast %9 : vector<8xf32> to vector<8x1xf32>
    %11 = arith.mulf %7, %3 : vector<8x1xf32>
    %12 = math.rsqrt %11 : vector<8x1xf32>
    %13 = arith.mulf %10, %12 : vector<8x1xf32>
    %c0_5 = arith.constant 0 : index
    %c0_6 = arith.constant 0 : index
    %14 = vector.load %arg3[%c0_5, %c0_6] : memref<8x32xf32, #tpu.memory_space<vmem>>, vector<8x32xf32>
    %15 = arith.mulf %14, %14 : vector<8x32xf32>
    %cst_7 = arith.constant dense<0.000000e+00> : vector<8xf32>
    %16 = vector.multi_reduction <add>, %15, %cst_7 [1] : vector<8x32xf32> to vector<8xf32>
    %17 = vector.shape_cast %16 : vector<8xf32> to vector<8x1xf32>
    %18 = arith.mulf %0, %14 : vector<8x32xf32>
    %cst_8 = arith.constant dense<0.000000e+00> : vector<8xf32>
    %19 = vector.multi_reduction <add>, %18, %cst_8 [1] : vector<8x32xf32> to vector<8xf32>
    %20 = vector.shape_cast %19 : vector<8xf32> to vector<8x1xf32>
    %21 = arith.mulf %17, %3 : vector<8x1xf32>
    %22 = math.rsqrt %21 : vector<8x1xf32>
    %23 = arith.mulf %20, %22 : vector<8x1xf32>
    %c0_9 = arith.constant 0 : index
    %c0_10 = arith.constant 0 : index
    %24 = vector.load %arg4[%c0_9, %c0_10] : memref<8x32xf32, #tpu.memory_space<vmem>>, vector<8x32xf32>
    %25 = arith.mulf %24, %24 : vector<8x32xf32>
    %cst_11 = arith.constant dense<0.000000e+00> : vector<8xf32>
    %26 = vector.multi_reduction <add>, %25, %cst_11 [1] : vector<8x32xf32> to vector<8xf32>
    %27 = vector.shape_cast %26 : vector<8xf32> to vector<8x1xf32>
    %28 = arith.mulf %0, %24 : vector<8x32xf32>
    %cst_12 = arith.constant dense<0.000000e+00> : vector<8xf32>
    %29 = vector.multi_reduction <add>, %28, %cst_12 [1] : vector<8x32xf32> to vector<8xf32>
    %30 = vector.shape_cast %29 : vector<8xf32> to vector<8x1xf32>
    %31 = arith.mulf %27, %3 : vector<8x1xf32>
    %32 = math.rsqrt %31 : vector<8x1xf32>
    %33 = arith.mulf %30, %32 : vector<8x1xf32>
    %c0_13 = arith.constant 0 : index
    %c0_14 = arith.constant 0 : index
    %34 = vector.load %arg5[%c0_13, %c0_14] : memref<8x32xf32, #tpu.memory_space<vmem>>, vector<8x32xf32>
    %35 = arith.mulf %34, %34 : vector<8x32xf32>
    %cst_15 = arith.constant dense<0.000000e+00> : vector<8xf32>
    %36 = vector.multi_reduction <add>, %35, %cst_15 [1] : vector<8x32xf32> to vector<8xf32>
    %37 = vector.shape_cast %36 : vector<8xf32> to vector<8x1xf32>
    %38 = arith.mulf %0, %34 : vector<8x32xf32>
    %cst_16 = arith.constant dense<0.000000e+00> : vector<8xf32>
    %39 = vector.multi_reduction <add>, %38, %cst_16 [1] : vector<8x32xf32> to vector<8xf32>
    %40 = vector.shape_cast %39 : vector<8xf32> to vector<8x1xf32>
    %41 = arith.mulf %37, %3 : vector<8x1xf32>
    %42 = math.rsqrt %41 : vector<8x1xf32>
    %43 = arith.mulf %40, %42 : vector<8x1xf32>
    %c0_17 = arith.constant 0 : index
    %c0_18 = arith.constant 0 : index
    %44 = vector.load %arg6[%c0_17, %c0_18] : memref<8x32xf32, #tpu.memory_space<vmem>>, vector<8x32xf32>
    %45 = arith.mulf %44, %44 : vector<8x32xf32>
    %cst_19 = arith.constant dense<0.000000e+00> : vector<8xf32>
    %46 = vector.multi_reduction <add>, %45, %cst_19 [1] : vector<8x32xf32> to vector<8xf32>
    %47 = vector.shape_cast %46 : vector<8xf32> to vector<8x1xf32>
    %48 = arith.mulf %0, %44 : vector<8x32xf32>
    %cst_20 = arith.constant dense<0.000000e+00> : vector<8xf32>
    %49 = vector.multi_reduction <add>, %48, %cst_20 [1] : vector<8x32xf32> to vector<8xf32>
    %50 = vector.shape_cast %49 : vector<8xf32> to vector<8x1xf32>
    %51 = arith.mulf %47, %3 : vector<8x1xf32>
    %52 = math.rsqrt %51 : vector<8x1xf32>
    %53 = arith.mulf %50, %52 : vector<8x1xf32>
    %54 = math.exp %13 : vector<8x1xf32>
    %55 = math.exp %23 : vector<8x1xf32>
    %56 = math.exp %33 : vector<8x1xf32>
    %57 = arith.addf %55, %56 : vector<8x1xf32>
    %58 = math.exp %43 : vector<8x1xf32>
    %59 = arith.addf %57, %58 : vector<8x1xf32>
    %60 = math.exp %53 : vector<8x1xf32>
    %61 = arith.addf %59, %60 : vector<8x1xf32>
    %cst_21 = arith.constant 1.000000e+00 : f32
    %62 = vector.broadcast %cst_21 : f32 to vector<8x1xf32>
    %63 = arith.mulf %62, %61 : vector<8x1xf32>
    %64 = arith.addf %54, %63 : vector<8x1xf32>
    %65 = math.log %64 : vector<8x1xf32>
    %66 = arith.subf %65, %13 : vector<8x1xf32>
    %67 = arith.cmpf ogt, %13, %23 : vector<8x1xf32>
    %68 = arith.cmpf ogt, %13, %33 : vector<8x1xf32>
    %69 = arith.andi %67, %68 : vector<8x1xi1>
    %70 = arith.extui %69 : vector<8x1xi1> to vector<8x1xi32>
    %71 = arith.sitofp %70 : vector<8x1xi32> to vector<8x1xf32>
    %72 = arith.cmpf ogt, %13, %43 : vector<8x1xf32>
    %73 = arith.cmpf ogt, %13, %53 : vector<8x1xf32>
    %74 = arith.andi %72, %73 : vector<8x1xi1>
    %75 = arith.extui %74 : vector<8x1xi1> to vector<8x1xi32>
    %76 = arith.sitofp %75 : vector<8x1xi32> to vector<8x1xf32>
    %c0_22 = arith.constant 0 : index
    %c0_23 = arith.constant 0 : index
    %77 = vector.load %arg7[%c0_22, %c0_23] : memref<8x3xf32, #tpu.memory_space<vmem>>, vector<8x1xf32>
    tpu.vector_store %arg7[%c0_22, %c0_23], %66 {strides = array<i32>} : memref<8x3xf32, #tpu.memory_space<vmem>>, vector<8x1xf32>,
    %c0_24 = arith.constant 0 : index
    %c1 = arith.constant 1 : index
    %78 = vector.load %arg7[%c0_24, %c1] : memref<8x3xf32, #tpu.memory_space<vmem>>, vector<8x1xf32>
    tpu.vector_store %arg7[%c0_24, %c1], %71 {strides = array<i32>} : memref<8x3xf32, #tpu.memory_space<vmem>>, vector<8x1xf32>,
    %c0_25 = arith.constant 0 : index
    %c2 = arith.constant 2 : index
    %79 = vector.load %arg7[%c0_25, %c2] : memref<8x3xf32, #tpu.memory_space<vmem>>, vector<8x1xf32>
    tpu.vector_store %arg7[%c0_25, %c2], %76 {strides = array<i32>} : memref<8x3xf32, #tpu.memory_space<vmem>>, vector<8x1xf32>,
    return
  }
  func.func @transform_0(%arg0: i32) -> (i32, i32) {
    %c0_i32 = arith.constant 0 : i32
    %c0_i32_0 = arith.constant 0 : i32
    return %arg0, %c0_i32 : i32, i32
  }
  func.func @transform_1(%arg0: i32) -> (i32, i32) {
    %c0_i32 = arith.constant 0 : i32
    %c0_i32_0 = arith.constant 0 : i32
    return %arg0, %c0_i32 : i32, i32
  }
  func.func @transform_2(%arg0: i32) -> (i32, i32) {
    %c0_i32 = arith.constant 0 : i32
    %c0_i32_0 = arith.constant 0 : i32
    return %arg0, %c0_i32 : i32, i32
  }
  func.func @transform_3(%arg0: i32) -> (i32, i32) {
    %c0_i32 = arith.constant 0 : i32
    %c0_i32_0 = arith.constant 0 : i32
    return %arg0, %c0_i32 : i32, i32
  }
  func.func @transform_4(%arg0: i32) -> (i32, i32) {
    %c0_i32 = arith.constant 0 : i32
    %c0_i32_0 = arith.constant 0 : i32
    return %arg0, %c0_i32 : i32, i32
  }
  func.func @transform_5(%arg0: i32) -> (i32, i32) {
    %c0_i32 = arith.constant 0 : i32
    %c0_i32_0 = arith.constant 0 : i32
    return %arg0, %c0_i32 : i32, i32
  }
  func.func @transform_6(%arg0: i32) -> (i32, i32) {
    %c0_i32 = arith.constant 0 : i32
    %c0_i32_0 = arith.constant 0 : i32
    return %arg0, %c0_i32 : i32, i32
  }
}

</mosaic_0001>

<bundles_post_ra>
// kernel: tpu_custom_call.1
= control target key start
LH: loop header
LB: loop body
LE: loop exit
PB: predicated region body
PF: predicated region fallthrough
CT: control target
= control target key end

     0   :  { %11 = vsyncpa [#allocation3], 0  ;;  %s413_s0 = inlined_call_operand.hbm [shape: f32[8,32], index: 0, kind: input, shape index: {}]   ;;  %s414_s1 = inlined_call_operand.hbm [shape: f32[8,32], index: 1, kind: input, shape index: {}]   ;;  %s415_s2 = inlined_call_operand.hbm [shape: f32[8,32], index: 2, kind: input, shape index: {}]   ;;  %s416_s3 = inlined_call_operand.vmem [shape: f32[8,32], index: 3, kind: input, shape index: {}]   ;;  %s417_s4 = inlined_call_operand.hbm [shape: f32[8,32], index: 4, kind: input, shape index: {}]   ;;  %s418_s5 = inlined_call_operand.vmem [shape: f32[8,32], index: 5, kind: input, shape index: {}]   ;;  %s419_s6 = inlined_call_operand.vmem [shape: f32[8,3], index: 6, kind: output, shape index: {}]  }
   0x1   :  { %12 = vsyncpa [#allocation5], 0 }
   0x2   :  { %13 = vsyncpa [#allocation8], 0  ;;  %s299_s21 = smov [#allocation4]   ;;  %s300_s23 = smov [#allocation2]  }
   0x3   :  { %s30_s22 = sshll.u32 %s299_s21, 4  ;;  %s20_s24 = sshll.u32 %s300_s23, 4  ;;  %s31_s22 = int_to_ptr.vmem [resolvable:$true] %s30_s22  ;;  %s21_s24 = int_to_ptr.vmem [resolvable:$true] %s20_s24 }
   0x4   :  { %s205_s27 = scalar_lea.hbm %s414_s1, 128 }
   0x5   :  { %p206_p0 = scmp.ne.s32.totalorder %s414_s1, %s205_s27  ;;  %p209_p1 = scmp.lt.u32.totalorder %s205_s27, %s414_s1 }
   0x7   :  { %p211_p2 = pnand %p209_p1, %p206_p0 }
   0x9   :  { %214 = shalt.err (!%p211_p2)
}
   0xa   :  { %s215_s8 = scalar_lea.vmem %s31_s22, 128  ;;  %p220_p4 = scmp.lt.s32.totalorder %s31_s22, %s31_s22 }
   0xb   :  { %p216_p3 = scmp.ne.s32.totalorder %s31_s22, %s215_s8  ;;  %p221_p5 = scmp.lt.s32.totalorder %s215_s8, %s215_s8 }
   0xd   :  { %p222_p6 = por %p221_p5, %p220_p4 }
   0xf   :  { %p223_p7 = pnand %p222_p6, %p216_p3 }
  0x11   :  { %226 = shalt.err (!%p223_p7)
}
  0x12   :  { %33 = dma.hbm_to_vmem [thread:$0]  %s414_s1, 128, %s31_s22, [#allocation5]  }
  0x13   :  { %s227_s13 = scalar_lea.hbm %s413_s0, 128 }
  0x14   :  { %p228_p8 = scmp.ne.s32.totalorder %s413_s0, %s227_s13  ;;  %p231_p9 = scmp.lt.u32.totalorder %s227_s13, %s413_s0 }
  0x16   :  { %p233_p10 = pnand %p231_p9, %p228_p8 }
  0x18   :  { %236 = shalt.err (!%p233_p10)
}
  0x19   :  { %s237_s18 = scalar_lea.vmem %s21_s24, 128  ;;  %p242_p12 = scmp.lt.s32.totalorder %s21_s24, %s21_s24 }
  0x1a   :  { %p238_p11 = scmp.ne.s32.totalorder %s21_s24, %s237_s18  ;;  %p243_p13 = scmp.lt.s32.totalorder %s237_s18, %s237_s18 }
  0x1c   :  { %p244_p0 = por %p243_p13, %p242_p12 }
  0x1e   :  { %p245_p1 = pnand %p244_p0, %p238_p11 }
  0x20   :  { %248 = shalt.err (!%p245_p1)
}
  0x21   :  { %23 = dma.hbm_to_vmem [thread:$0]  %s413_s0, 128, %s21_s24, [#allocation3]  }
  0x22   :  { %s301_s20 = smov [#allocation6]   ;;  %s302_s22 = smov [#allocation7]  }
  0x23   :  { %s40_s21 = sshll.u32 %s301_s20, 4  ;;  %s52_s23 = sshll.u32 %s302_s22, 4  ;;  %s41_s21 = int_to_ptr.vmem [resolvable:$true] %s40_s21  ;;  %s53_s23 = int_to_ptr.vmem [resolvable:$true] %s52_s23 }
  0x24   :  { %s249_s27 = scalar_lea.hbm %s415_s2, 128 }
  0x25   :  { %p250_p2 = scmp.ne.s32.totalorder %s415_s2, %s249_s27  ;;  %p253_p3 = scmp.lt.u32.totalorder %s249_s27, %s415_s2 }
  0x27   :  { %p255_p4 = pnand %p253_p3, %p250_p2 }
  0x29   :  { %258 = shalt.err (!%p255_p4)
}
  0x2a   :  { %s259_s0 = scalar_lea.vmem %s41_s21, 128  ;;  %p264_p6 = scmp.lt.s32.totalorder %s41_s21, %s41_s21 }
  0x2b   :  { %p260_p5 = scmp.ne.s32.totalorder %s41_s21, %s259_s0  ;;  %p265_p7 = scmp.lt.s32.totalorder %s259_s0, %s259_s0 }
  0x2d   :  { %p266_p8 = por %p265_p7, %p264_p6 }
  0x2f   :  { %p267_p9 = pnand %p266_p8, %p260_p5 }
  0x31   :  { %270 = shalt.err (!%p267_p9)
}
  0x32   :  { %43 = dma.hbm_to_vmem [thread:$0]  %s415_s2, 128, %s41_s21, [#allocation5]  }
  0x33   :  { %s271_s11 = scalar_lea.hbm %s417_s4, 128 }
  0x34   :  { %p272_p10 = scmp.ne.s32.totalorder %s417_s4, %s271_s11  ;;  %p275_p11 = scmp.lt.u32.totalorder %s271_s11, %s417_s4 }
  0x36   :  { %p277_p12 = pnand %p275_p11, %p272_p10 }
  0x38   :  { %280 = shalt.err (!%p277_p12)
}
  0x39   :  { %s281_s16 = scalar_lea.vmem %s53_s23, 128  ;;  %p286_p0 = scmp.lt.s32.totalorder %s53_s23, %s53_s23 }
  0x3a   :  { %p282_p13 = scmp.ne.s32.totalorder %s53_s23, %s281_s16  ;;  %p287_p1 = scmp.lt.s32.totalorder %s281_s16, %s281_s16 }
  0x3c   :  { %p288_p2 = por %p287_p1, %p286_p0 }
  0x3e   :  { %p289_p3 = pnand %p288_p2, %p282_p13 }
  0x40   :  { %292 = shalt.err (!%p289_p3)
}
  0x41   :  { %55 = dma.hbm_to_vmem [thread:$0]  %s417_s4, 128, %s53_s23, [#allocation8]  }
  0x42   :  { %293 = dma.done.wait [#allocation3], 128  }
  0x43   :  { %294 = vsyncadd [#allocation3], 4294967168 }
  0x44   :  { %295 = dma.done.wait [#allocation5], 256  }
  0x45   :  { %296 = vsyncadd [#allocation5], 4294967040 }
  0x46   :  { %297 = dma.done.wait [#allocation8], 128  }
  0x47   :  { %298 = vsyncadd [#allocation8], 4294967168  ;;  %vm72_vm0 = vcmask 261120   ;;  %v100_v0 = vld [vmem:[%s416_s3] sm:$0xff]  ;;  %v112_v2 = vld [vmem:[#allocation7] sm:$0xff]  ;;  %vm163_vm5 = vcmask 7168  }
  0x48   :  { %v70_v1 = vld [vmem:[#allocation2] sm:$0xff]  ;;  %v101_v3 = vmul.f32 %v100_v0, %v100_v0  ;;  %v113_v5 = vmul.f32 %v112_v2, %v112_v2  ;;  %v88_v6 = vld [vmem:[#allocation6] sm:$0xff]  ;;  %v76_v8 = vld [vmem:[#allocation4] sm:$0xff]  ;;  %vm165_vm7 = vcmask 15368   ;;  %vm167_vm9 = vcmask 23568  }
  0x49   :  { %v71_v4 = vmul.f32 %v70_v1, %v70_v1  ;;  %v89_v7 = vmul.f32 %v88_v6, %v88_v6  ;;  %v124_v9 = vld [vmem:[%s418_s5] sm:$0xff]  ;;  %v77_v14 = vmul.f32 %v76_v8, %v76_v8  ;;  %v105_v18 = vmul.f32 %v100_v0, %v70_v1 }
  0x4a   :  { %v102_v10 = vsel %vm72_vm0, %v101_v3, 0.0  ;;  %v114_v12 = vsel %vm72_vm0, %v113_v5, 0.0  ;;  %v125_v15 = vmul.f32 %v124_v9, %v124_v9  ;;  %v93_v19 = vmul.f32 %v88_v6, %v70_v1 }
  0x4b   :  { %v73_v11 = vsel %vm72_vm0, %v71_v4, 0.0  ;;  %103 = vadd.xlane.f32.xlu1 %v102_v10  ;;  %v90_v13 = vsel %vm72_vm0, %v89_v7, 0.0  ;;  %v78_v16 = vsel %vm72_vm0, %v77_v14, 0.0  ;;  %v106_v20 = vsel %vm72_vm0, %v105_v18, 0.0 }
  0x4c   :  { %74 = vadd.xlane.f32.xlu0 %v73_v11  ;;  %v126_v17 = vsel %vm72_vm0, %v125_v15, 0.0  ;;  %v94_v21 = vsel %vm72_vm0, %v93_v19, 0.0  ;;  %v117_v22 = vmul.f32 %v112_v2, %v70_v1  ;;  %v129_v23 = vmul.f32 %v124_v9, %v70_v1 }
  0x4d   :  { %v81_v26 = vmul.f32 %v76_v8, %v70_v1  ;;  %v303_v7 = vmov 0.0  }
  0x4e   :  { %v118_v24 = vsel %vm72_vm0, %v117_v22, 0.0  ;;  %v130_v25 = vsel %vm72_vm0, %v129_v23, 0.0 }
  0x4f   :  { %115 = vadd.xlane.f32.xlu1 %v114_v12  ;;  %v82_v27 = vsel %vm72_vm0, %v81_v26, 0.0 }
  0x50   :  { %91 = vadd.xlane.f32.xlu0 %v90_v13 }
  0x53   :  { %79 = vadd.xlane.f32.xlu1 %v78_v16 }
  0x54   :  { %127 = vadd.xlane.f32.xlu0 %v126_v17 }
  0x57   :  { %107 = vadd.xlane.f32.xlu1 %v106_v20 }
  0x58   :  { %95 = vadd.xlane.f32.xlu0 %v94_v21 }
  0x5b   :  { %131 = vadd.xlane.f32.xlu1 %v130_v25 }
  0x5c   :  { %119 = vadd.xlane.f32.xlu0 %v118_v24 }
  0x60   :  { %83 = vadd.xlane.f32.xlu0 %v82_v27 }
  0xd8   :  { %v104_v28 = vpop.xlane.xlu1 %103 }
  0xd9   :  { %v75_v29 = vpop.xlane.xlu0 %74 }
  0xda   :  { %v109_v30 = vmul.f32 %v104_v28, %v75_v29 }
  0xdc   :  { %183 = vrsqrt.f32 %v109_v30  ;;  %v116_v31 = vpop.xlane.xlu1 %115 }
  0xdd   :  { %v92_v32 = vpop.xlane.xlu0 %91  ;;  %v121_v33 = vmul.f32 %v116_v31, %v75_v29 }
  0xde   :  { %v97_v34 = vmul.f32 %v92_v32, %v75_v29 }
  0xdf   :  { %185 = vrsqrt.f32 %v121_v33 }
  0xe0   :  { %187 = vrsqrt.f32 %v97_v34  ;;  %v80_v35 = vpop.xlane.xlu1 %79 }
  0xe1   :  { %v128_v36 = vpop.xlane.xlu0 %127  ;;  %v85_v37 = vmul.f32 %v80_v35, %v75_v29 }
  0xe2   :  { %v133_v38 = vmul.f32 %v128_v36, %v75_v29 }
  0xe3   :  { %189 = vrsqrt.f32 %v85_v37 }
  0xe4   :  { %191 = vrsqrt.f32 %v133_v38  ;;  %v108_v39 = vpop.xlane.xlu1 %107 }
  0xe5   :  { %v96_v40 = vpop.xlane.xlu0 %95 }
  0xe6   :  { %v184_v41 = vpop.eup %183 }
  0xe7   :  { %v111_v42 = vmul.f32 %v184_v41, %v108_v39 }
  0xe8   :  { %v132_v49 = vpop.xlane.xlu1 %131 }
  0xe9   :  { %v120_v43 = vpop.xlane.xlu0 %119  ;;  %v186_v44 = vpop.eup %185  ;;  %v140_v46 = vmul.f32 1.442695, %v111_v42 }
  0xea   :  { %v188_v45 = vpop.eup %187  ;;  %v123_v47 = vmul.f32 %v186_v44, %v120_v43 }
  0xeb   :  { %v99_v48 = vmul.f32 %v188_v45, %v96_v40  ;;  %193 = vpow2.f32 %v140_v46 }
  0xec   :  { %v143_v53 = vmul.f32 1.442695, %v123_v47 }
  0xed   :  { %v84_v50 = vpop.xlane.xlu0 %83  ;;  %v190_v51 = vpop.eup %189  ;;  %v138_v52 = vmul.f32 1.442695, %v99_v48 }
  0xee   :  { %v192_v54 = vpop.eup %191  ;;  %v87_v55 = vmul.f32 %v190_v51, %v84_v50 }
  0xef   :  { %195 = vpow2.f32 %v138_v52  ;;  %v135_v56 = vmul.f32 %v192_v54, %v132_v49 }
  0xf0   :  { %197 = vpow2.f32 %v143_v53  ;;  %v136_v58 = vmul.f32 1.442695, %v87_v55  ;;  %vm153_vm1 = vcmp.gt.f32.partialorder %v87_v55, %v99_v48  ;;  %vm154_vm2 = vcmp.gt.f32.partialorder %v87_v55, %v111_v42 }
  0xf1   :  { %v146_v57 = vmul.f32 1.442695, %v135_v56  ;;  %vm158_vm3 = vcmp.gt.f32.partialorder %v87_v55, %v123_v47  ;;  %vm159_vm4 = vcmp.gt.f32.partialorder %v87_v55, %v135_v56  ;;  %vm155_vm6 = vmand %vm153_vm1, %vm154_vm2 }
  0xf2   :  { %vm160_vm8 = vmand %vm158_vm3, %vm159_vm4  ;;  %v176_v8 = vsel %vm155_vm6, 1.0, %v303_v7 }
  0xf3   :  { %199 = vpow2.f32 %v146_v57  ;;  %v177_v9 = vsel %vm160_vm8, 1.0, %v303_v7 }
  0xf4   :  { %201 = vpow2.f32 %v136_v58 }
  0xf5   :  { %v194_v59 = vpop.eup %193 }
  0xf9   :  { %v196_v60 = vpop.eup %195 }
  0xfa   :  { %v142_v61 = vadd.f32 %v196_v60, %v194_v59  ;;  %v198_v62 = vpop.eup %197 }
  0xfc   :  { %v145_v63 = vadd.f32 %v198_v62, %v142_v61 }
  0xfd   :  { %v200_v0 = vpop.eup %199 }
  0xfe   :  { %v148_v1 = vadd.f32 %v200_v0, %v145_v63  ;;  %v202_v2 = vpop.eup %201 }
 0x100   :  { %v149_v3 = vadd.f32 %v202_v2, %v148_v1 }
 0x102   :  { %203 = vlog2.f32 %v149_v3 }
 0x10c   :  { %v204_v4 = vpop.eup %203 }
 0x10d   :  { %v151_v5 = vmul.f32 0.6931472, %v204_v4 }
 0x10f   :  { %v152_v6 = vsub.f32 %v151_v5, %v87_v55 }
 0x111   :  { %164 = vst.msk [vmem:[%s419_s6] sm:$0xff] %vm163_vm5, %v152_v6 }
 0x112   :  { %166 = vst.msk [vmem:[%s419_s6] sm:$0xff] %vm165_vm7, %v176_v8 }
 0x113   :  { %168 = vst.msk [vmem:[%s419_s6] sm:$0xff] %vm167_vm9, %v177_v9 }
 0x114   :  { %173 = vsyncpa [#allocation3], 1 }
 0x115   :  { %174 = vsyncpa [#allocation5], 1 }
 0x116   :  { %175 = vsyncpa [#allocation8], 1 }

</bundles_post_ra>
